<compile_context>
chip_gen: v6e
topology: v6e:2x2x1
jax: 0.10.0
libtpu: 0.0.40
codegen_flags: <defaults>
</compile_context>

<pallas_src>
import jax
import jax.numpy as jnp
from jax.experimental import pallas as pl
from jax.experimental.pallas import tpu as pltpu


def _round_up(x, m):
    return ((x + m - 1) // m) * m


def linear_kernel(x_ref, w_ref, b_ref, o_ref):
    # MXU matmul with f32 accumulation + bias add (VPU), lane-dense output tile.
    acc = jnp.dot(x_ref[...], w_ref[...], preferred_element_type=jnp.float32)
    o_ref[...] = (acc + b_ref[...]).astype(o_ref.dtype)


def linear_classifier_forward(x, w, b, input_size, *, tm_target=1024):
    """Pallas equivalent of LinearClassifier.forward.

    x: any shape whose total element count is a multiple of input_size.
    w: (input_size, output_size)  (already transposed vs. torch's fc.weight)
    b: (output_size,)
    """
    x2d = x.reshape(-1, input_size)            # x.view(-1, input_size)
    M, K = x2d.shape
    N = w.shape[1]

    # Lane-dense output/weight: pad N to a multiple of 128.
    n_pad = _round_up(N, 128)
    # Row tile: multiple of 8 (f32 sublane), capped at tm_target; pad M so the
    # grid divides evenly (no masked tail tiles).
    tm = min(tm_target, _round_up(M, 8))
    m_pad = _round_up(M, tm)

    x_p = x2d if m_pad == M else jnp.pad(x2d, ((0, m_pad - M), (0, 0)))
    w_p = w if n_pad == N else jnp.pad(w, ((0, 0), (0, n_pad - N)))
    b_p = (b if n_pad == N else jnp.pad(b, (0, n_pad - N))).reshape(1, n_pad)

    out_padded = pl.pallas_call(
        linear_kernel,
        out_shape=jax.ShapeDtypeStruct((m_pad, n_pad), x2d.dtype),
        grid=(m_pad // tm,),
        in_specs=[
            pl.BlockSpec((tm, K), lambda i: (i, 0)),      # x: tiled over rows
            pl.BlockSpec((K, n_pad), lambda i: (0, 0)),   # w: VMEM-resident
            pl.BlockSpec((1, n_pad), lambda i: (0, 0)),   # b: VMEM-resident
        ],
        out_specs=pl.BlockSpec((tm, n_pad), lambda i: (i, 0)),
        compiler_params=pltpu.CompilerParams(
            dimension_semantics=("parallel",)),
    )(x_p, w_p, b_p)

    return out_padded[:M, :N]


if __name__ == "__main__":
    # Module config: input_size = 4 * 8 * 8 = 256, output_size = 16
    input_size = 256
    output_size = 16

    key = jax.random.PRNGKey(0)
    kx, kw, kb = jax.random.split(key, 3)

    # Example input: batch of 8 "images" of shape (4, 8, 8); view(-1, 256) -> (8, 256)
    x = jax.random.normal(kx, (8, 4, 8, 8), dtype=jnp.float32)

    # Deterministic parameter init mimicking nn.Linear: U(-1/sqrt(K), 1/sqrt(K))
    bound = 1.0 / jnp.sqrt(jnp.float32(input_size))
    w = jax.random.uniform(kw, (input_size, output_size), jnp.float32,
                           minval=-bound, maxval=bound)
    b = jax.random.uniform(kb, (output_size,), jnp.float32,
                           minval=-bound, maxval=bound)

    out = linear_classifier_forward(x, w, b, input_size)
    out = jax.block_until_ready(out)

    # Reference check (plain JAX) to make sure semantics match torch's Linear.
    ref = x.reshape(-1, input_size) @ w + b
    assert out.shape == (8, output_size)
    assert jnp.allclose(out, ref, atol=1e-5, rtol=1e-5)

    print("KERNEL_OK")
</pallas_src>

<mosaic_0001>
module attributes {stable_mosaic.version = 11 : i64} {
  func.func @linear_kernel(%arg0: i32, %arg1: memref<8x256xf32, #tpu.memory_space<vmem>>, %arg2: memref<256x128xf32, #tpu.memory_space<vmem>>, %arg3: memref<1x128xf32, #tpu.memory_space<vmem>>, %arg4: memref<8x128xf32, #tpu.memory_space<vmem>>) attributes {dimension_semantics = [#tpu.dimension_semantics<parallel>], iteration_bounds = array<i64: 1>, scalar_prefetch = 0 : i64, scratch_operands = 0 : i64, tpu.core_type = #tpu.core_type<tc>, window_params = [{transform_indices = @transform_0, window_bounds = array<i64: 8, 256>}, {pipeline_mode = #tpu.pipeline_mode<synchronous>, transform_indices = @transform_1, window_bounds = array<i64: 256, 128>}, {pipeline_mode = #tpu.pipeline_mode<synchronous>, transform_indices = @transform_2, window_bounds = array<i64: 1, 128>}, {transform_indices = @transform_3, window_bounds = array<i64: 8, 128>}]} {
    %c0 = arith.constant 0 : index
    %c0_0 = arith.constant 0 : index
    %0 = vector.load %arg1[%c0, %c0_0] : memref<8x256xf32, #tpu.memory_space<vmem>>, vector<8x256xf32>
    %c0_1 = arith.constant 0 : index
    %c0_2 = arith.constant 0 : index
    %1 = vector.load %arg2[%c0_1, %c0_2] : memref<256x128xf32, #tpu.memory_space<vmem>>, vector<256x128xf32>
    %cst = arith.constant dense<0.000000e+00> : vector<8x128xf32>
    %2 = tpu.matmul %0, %1, %cst {dimension_numbers = #tpu.dot_dimension_numbers<[1], [0], [0], [1], [0, 0, 1, 1], [], []>} : vector<8x256xf32>, vector<256x128xf32>, vector<8x128xf32> -> vector<8x128xf32>
    %c0_3 = arith.constant 0 : index
    %c0_4 = arith.constant 0 : index
    %3 = vector.load %arg3[%c0_3, %c0_4] : memref<1x128xf32, #tpu.memory_space<vmem>>, vector<1x128xf32>
    %4 = vector.broadcast %3 : vector<1x128xf32> to vector<8x128xf32>
    %5 = arith.addf %2, %4 : vector<8x128xf32>
    %c0_5 = arith.constant 0 : index
    %c0_6 = arith.constant 0 : index
    %6 = vector.load %arg4[%c0_5, %c0_6] : memref<8x128xf32, #tpu.memory_space<vmem>>, vector<8x128xf32>
    tpu.vector_store %arg4[%c0_5, %c0_6], %5 {strides = array<i32>} : memref<8x128xf32, #tpu.memory_space<vmem>>, vector<8x128xf32>,
    return
  }
  func.func @transform_0(%arg0: i32) -> (i32, i32) {
    %c0_i32 = arith.constant 0 : i32
    %c0_i32_0 = arith.constant 0 : i32
    return %arg0, %c0_i32 : i32, i32
  }
  func.func @transform_1(%arg0: i32) -> (i32, i32) {
    %c0_i32 = arith.constant 0 : i32
    %c0_i32_0 = arith.constant 0 : i32
    %c0_i32_1 = arith.constant 0 : i32
    return %c0_i32, %c0_i32_0 : i32, i32
  }
  func.func @transform_2(%arg0: i32) -> (i32, i32) {
    %c0_i32 = arith.constant 0 : i32
    %c0_i32_0 = arith.constant 0 : i32
    %c0_i32_1 = arith.constant 0 : i32
    return %c0_i32, %c0_i32_0 : i32, i32
  }
  func.func @transform_3(%arg0: i32) -> (i32, i32) {
    %c0_i32 = arith.constant 0 : i32
    %c0_i32_0 = arith.constant 0 : i32
    return %arg0, %c0_i32 : i32, i32
  }
}

</mosaic_0001>

<bundles_post_ra>
// kernel: tpu_custom_call.1
= control target key start
LH: loop header
LB: loop body
LE: loop exit
PB: predicated region body
PF: predicated region fallthrough
CT: control target
= control target key end

     0   :  { %8 = vsyncpa [#allocation3], 0  ;;  %s313_s0 = inlined_call_operand.hbm [shape: f32[8,256], index: 0, kind: input, shape index: {}]   ;;  %s314_s1 = inlined_call_operand.hbm [shape: f32[256,128], index: 1, kind: input, shape index: {}]   ;;  %s315_s2 = inlined_call_operand.vmem [shape: f32[1,128], index: 2, kind: input, shape index: {}]   ;;  %s316_s3 = inlined_call_operand.hbm [shape: f32[8,128], index: 3, kind: output, shape index: {}]  }
   0x1   :  { %9 = vsyncpa [#allocation6], 0 }
   0x2   :  { %10 = vsyncpa [#allocation4], 0  ;;  %s276_s12 = smov [#allocation2]   ;;  %s277_s14 = smov [#allocation5]  }
   0x3   :  { %s17_s13 = sshll.u32 %s276_s12, 4  ;;  %s26_s15 = sshll.u32 %s277_s14, 4  ;;  %s18_s13 = int_to_ptr.vmem [resolvable:$true] %s17_s13  ;;  %s27_s15 = int_to_ptr.vmem [resolvable:$true] %s26_s15 }
   0x4   :  { %s218_s16 = scalar_lea.vmem %s18_s13, 256  ;;  %p223_p1 = scmp.lt.s32.totalorder %s18_s13, %s18_s13 }
   0x5   :  { %p219_p0 = scmp.ne.s32.totalorder %s18_s13, %s218_s16  ;;  %p224_p2 = scmp.lt.s32.totalorder %s218_s16, %s218_s16 }
   0x7   :  { %p225_p3 = por %p224_p2, %p223_p1 }
   0x9   :  { %p226_p4 = pnand %p225_p3, %p219_p0 }
   0xb   :  { %229 = shalt.err (!%p226_p4)
}
   0xc   :  { %20 = dma.hbm_to_vmem [thread:$0]  %s313_s0, 256, %s18_s13, [#allocation3]  }
   0xd   :  { %s238_s19 = scalar_lea.vmem %s27_s15, 4096  ;;  %p243_p6 = scmp.lt.s32.totalorder %s27_s15, %s27_s15 }
   0xe   :  { %p239_p5 = scmp.ne.s32.totalorder %s27_s15, %s238_s19  ;;  %p244_p7 = scmp.lt.s32.totalorder %s238_s19, %s238_s19 }
  0x10   :  { %p245_p8 = por %p244_p7, %p243_p6 }
  0x12   :  { %p246_p9 = pnand %p245_p8, %p239_p5 }
  0x14   :  { %249 = shalt.err (!%p246_p9)
}
  0x15   :  { %s278_s20 = smov 128   ;;  %s279_s21 = smov 8  }
  0x16   :  { %32 = dma.hbm_to_vmem [thread:$0]  %s314_s1, 4096, %s27_s15, [#allocation6], %s278_s20, %s278_s20, %s279_s21  }
  0x17   :  { %270 = dma.done.wait [#allocation3], 256  }
  0x18   :  { %271 = vsyncadd [#allocation3], 4294967040 }
  0x19   :  { %272 = dma.done.wait [#allocation6], 4096  }
  0x1a   :  { %273 = vsyncadd [#allocation6], 4294963200  ;;  %v74_v0 = vld [vmem:[#allocation5 + $0xf8] sm:$0xff]  ;;  %v73_v2 = vld [vmem:[#allocation5 + $0xf0] sm:$0xff]  ;;  %s280_s24 = smov [#allocation7]  }
  0x1b   :  { %v58_v1 = vld [vmem:[#allocation5 + $0x78] sm:$0xff]  ;;  %170 = vmatprep.subr.mxu0 %v74_v0  ;;  %v57_v3 = vld [vmem:[#allocation5 + $0x70] sm:$0xff]  ;;  %v72_v4 = vld [vmem:[#allocation5 + $0xe8] sm:$0xff]  ;;  %s159_s25 = sshll.u32 %s280_s24, 4  ;;  %s160_s25 = int_to_ptr.vmem [resolvable:$true] %s159_s25 }
  0x1c   :  { %171 = vmatpush3.msra.mxu0 %v58_v1  ;;  %v56_v5 = vld [vmem:[#allocation5 + $0x68] sm:$0xff]  ;;  %v71_v6 = vld [vmem:[#allocation5 + $0xe0] sm:$0xff]  ;;  %v70_v8 = vld [vmem:[#allocation5 + $0xd8] sm:$0xff]  ;;  %s250_s26 = scalar_lea.vmem %s160_s25, 128  ;;  %p255_p11 = scmp.lt.s32.totalorder %s160_s25, %s160_s25 }
  0x1d   :  { %172 = vmatprep.subr.mxu0 %v73_v2  ;;  %v55_v7 = vld [vmem:[#allocation5 + $0x60] sm:$0xff]  ;;  %v54_v9 = vld [vmem:[#allocation5 + $0x58] sm:$0xff]  ;;  %v69_v10 = vld [vmem:[#allocation5 + $0xd0] sm:$0xff]  ;;  %p251_p10 = scmp.ne.s32.totalorder %s160_s25, %s250_s26  ;;  %p256_p12 = scmp.lt.s32.totalorder %s250_s26, %s250_s26 }
  0x1e   :  { %173 = vmatpush3.msra.mxu0 %v57_v3  ;;  %v53_v11 = vld [vmem:[#allocation5 + $0x50] sm:$0xff]  ;;  %v68_v12 = vld [vmem:[#allocation5 + $0xc8] sm:$0xff]  ;;  %v42_v13 = vld [vmem:[#allocation2 + $0x8] sm:$0xff] }
  0x1f   :  { %174 = vmatprep.subr.mxu0 %v72_v4  ;;  %v52_v14 = vld [vmem:[#allocation5 + $0x48] sm:$0xff]  ;;  %146 = vmatprep.mubr.f32.mxu0 %v42_v13  ;;  %v67_v15 = vld [vmem:[#allocation5 + $0xc0] sm:$0xff]  ;;  %v66_v17 = vld [vmem:[#allocation5 + $0xb8] sm:$0xff]  ;;  %p257_p13 = por %p256_p12, %p255_p11 }
  0x20   :  { %175 = vmatpush3.msra.mxu0 %v56_v5  ;;  %v51_v16 = vld [vmem:[#allocation5 + $0x40] sm:$0xff]  ;;  %v50_v18 = vld [vmem:[#allocation5 + $0x38] sm:$0xff]  ;;  %v65_v19 = vld [vmem:[#allocation5 + $0xb0] sm:$0xff] }
  0x21   :  { %176 = vmatprep.subr.mxu0 %v71_v6  ;;  %v49_v20 = vld [vmem:[#allocation5 + $0x30] sm:$0xff]  ;;  %v64_v21 = vld [vmem:[#allocation5 + $0xa8] sm:$0xff]  ;;  %v63_v23 = vld [vmem:[#allocation5 + $0xa0] sm:$0xff]  ;;  %p258_p0 = pnand %p257_p13, %p251_p10 }
  0x22   :  { %177 = vmatpush3.msra.mxu0 %v55_v7  ;;  %v48_v22 = vld [vmem:[#allocation5 + $0x28] sm:$0xff]  ;;  %v47_v24 = vld [vmem:[#allocation5 + $0x20] sm:$0xff]  ;;  %v62_v25 = vld [vmem:[#allocation5 + $0x98] sm:$0xff] }
  0x23   :  { %178 = vmatprep.subr.mxu0 %v70_v8  ;;  %v46_v26 = vld [vmem:[#allocation5 + $0x18] sm:$0xff]  ;;  %v61_v27 = vld [vmem:[#allocation5 + $0x90] sm:$0xff]  ;;  %v60_v29 = vld [vmem:[#allocation5 + $0x88] sm:$0xff] }
  0x24   :  { %179 = vmatpush3.msra.mxu0 %v54_v9  ;;  %v45_v28 = vld [vmem:[#allocation5 + $0x10] sm:$0xff]  ;;  %v44_v30 = vld [vmem:[#allocation5 + $0x8] sm:$0xff]  ;;  %v59_v31 = vld [vmem:[#allocation5 + $0x80] sm:$0xff] }
  0x25   :  { %180 = vmatprep.subr.mxu0 %v69_v10  ;;  %v43_v32 = vld [vmem:[#allocation5] sm:$0xff]  ;;  %v41_v33 = vld [vmem:[#allocation2] sm:$0xff] }
  0x26   :  { %181 = vmatpush3.msra.mxu0 %v53_v11  ;;  %v169_v35 = vld [vmem:[%s315_s2] ss:$0 sm:$0xff] }
  0x27   :  { %182 = vmatprep.subr.mxu0 %v68_v12 }
  0x28   :  { %183 = vmatpush3.msra.mxu0 %v52_v14 }
  0x29   :  { %184 = vmatprep.subr.mxu0 %v67_v15 }
  0x2a   :  { %185 = vmatpush3.msra.mxu0 %v51_v16 }
  0x2b   :  { %186 = vmatprep.subr.mxu0 %v66_v17 }
  0x2c   :  { %187 = vmatpush3.msra.mxu0 %v50_v18 }
  0x2d   :  { %188 = vmatprep.subr.mxu0 %v65_v19 }
  0x2e   :  { %189 = vmatpush3.msra.mxu0 %v49_v20 }
  0x2f   :  { %190 = vmatprep.subr.mxu0 %v64_v21 }
  0x30   :  { %191 = vmatpush3.msra.mxu0 %v48_v22 }
  0x31   :  { %192 = vmatprep.subr.mxu0 %v63_v23 }
  0x32   :  { %193 = vmatpush3.msra.mxu0 %v47_v24 }
  0x33   :  { %194 = vmatprep.subr.mxu0 %v62_v25 }
  0x34   :  { %195 = vmatpush3.msra.mxu0 %v46_v26 }
  0x35   :  { %196 = vmatprep.subr.mxu0 %v61_v27 }
  0x36   :  { %197 = vmatpush3.msra.mxu0 %v45_v28 }
  0x37   :  { %198 = vmatprep.subr.mxu0 %v60_v29 }
  0x38   :  { %199 = vmatpush3.msra.mxu0 %v44_v30 }
  0x39   :  { %200 = vmatprep.subr.mxu0 %v59_v31 }
  0x3a   :  { %201 = vmatpush3.msra.mxu0 %v43_v32 }
  0x3b   :  { %147 = vmatmul.mubr.f32.vlgmr.msra.gmra.mxu0 %v41_v33 }
  0xfb   :  { %v202_v34 = vpop.f32.mrf.mxu0 }
  0xfd   :  { %v203_v36 = vpop.f32.mrf.mxu0 }
  0xfe   :  { %v204_v37 = vadd.f32 %v203_v36, %v202_v34 }
 0x100   :  { %v149_v38 = vadd.f32 %v204_v37, %v169_v35 }
 0x102   :  { %152 = vst [vmem:[#allocation7] sm:$0xff] %v149_v38 }
 0x103   :  { %261 = shalt.err (!%p258_p0)
}
 0x104   :  { %162 = dma.vmem_to_hbm [thread:$0]  %s160_s25, 128, %s316_s3, [#allocation4]  }
 0x105   :  { %274 = dma.done.wait [#allocation4], 128  }
 0x106   :  { %275 = vsyncadd [#allocation4], 4294967168 }
 0x107   :  { %166 = vsyncpa [#allocation3], 1 }
 0x108   :  { %167 = vsyncpa [#allocation6], 1 }
 0x109   :  { %168 = vsyncpa [#allocation4], 1 }

</bundles_post_ra>
